<compile_context>
chip_gen: v7x
topology: tpu7x:2x2x1
jax: 0.10.0
libtpu: 0.0.40
codegen_flags: <defaults>
</compile_context>

<pallas_src>
import math

import jax
import jax.numpy as jnp
from jax.experimental import pallas as pl
from jax.experimental.pallas import tpu as pltpu


def _round_up(a, b):
    return ((a + b - 1) // b) * b


# ------------------------- kernel 1: node scores ----------------------------

def _score_kernel(x_ref, w_ref, score_ref):
    # x_ref: (tile_n, C), w_ref: (1, C) (already L2-normalized), score_ref: (1, tile_n)
    # dot_general contracting C of both operands gives the (1, tile_n) result directly
    # lane-dense (no (N,1) masked stores).
    # TODO(synk): verify via pl.lower_as_mlir that this contraction does not emit a
    # full (tile_n, C) transpose of the x tile; if it does, switch to x @ w_col and
    # transpose only the narrow (tile_n, 1) result.
    s = jax.lax.dot_general(
        w_ref[...], x_ref[...],
        dimension_numbers=(((1,), (1,)), ((), ())),
        preferred_element_type=jnp.float32,
    )                                      # (1, tile_n) f32
    score_ref[...] = jnp.tanh(s)


def score_pallas(x, w_normalized, *, target_tile_bytes=2 << 20, max_tile_rows=4096,
                 vmem_limit_bytes=32 * 1024 * 1024):
    """Returns per-node scores, shape (N,), float32."""
    n, c = x.shape
    itemsize = x.dtype.itemsize

    # Size the tile by bytes (~target_tile_bytes of x per tile), rounded to 128 rows
    # so the lane-dense (1, tile_n) output block satisfies the lane constraint.
    # TODO(synk): for extremely large C the minimum 128-row tile may exceed VMEM;
    # that would need an additional reduction over C with an accumulator.
    rows = max(128, _round_up(target_tile_bytes // (itemsize * c), 128))
    rows = min(rows, max_tile_rows)
    # Keep >= 2 tiles when the array is big enough that splitting across v7x's two
    # TensorCores pays for the extra grid step.
    if rows >= n and n * c * itemsize > (1 << 20) and n > 256:
        rows = max(128, _round_up(pl.cdiv(n, 2), 128))

    if rows >= n:
        tile_n = n            # single tile: block == full array dims (no (8,128) rule)
    else:
        tile_n = rows         # multiple of 128: satisfies sublane(8)/lane(128) rules
    grid = (pl.cdiv(n, tile_n),)   # partial last block handled by Pallas masking

    score = pl.pallas_call(
        _score_kernel,
        out_shape=jax.ShapeDtypeStruct((1, n), jnp.float32),
        grid=grid,
        in_specs=[
            pl.BlockSpec((tile_n, c), lambda i: (i, 0)),
            pl.BlockSpec((1, c), lambda i: (0, 0)),
        ],
        out_specs=pl.BlockSpec((1, tile_n), lambda i: (0, i)),   # lane-dense scores
        compiler_params=pltpu.CompilerParams(
            dimension_semantics=("parallel",),
            vmem_limit_bytes=vmem_limit_bytes),
        cost_estimate=pl.CostEstimate(
            flops=2 * n * c,
            transcendentals=n,
            bytes_accessed=n * c * itemsize + n * 4 + c * itemsize),
    )(x, w_normalized)
    # Garbage lanes of a partial last tile (if any) are sliced off here, before top_k.
    return score[0, :n]


# -------- kernel 2: batched row gather + scale (scalar prefetch + manual DMA) ------

def _gather_scale_kernel(perm_ref, sc_ref, x_hbm, out_ref, xbuf, sems):
    # perm_ref: SMEM (k_pad,) int32 scalar-prefetch (row indices to gather)
    # sc_ref:   (R, 1) f32 block of score[perm] for this step
    # x_hbm:    full (N, C) node features left in HBM (memory_space=pl.ANY)
    # out_ref:  (R, C) output block
    # xbuf:     VMEM (2, R, C) double buffer ; sems: DMA sems (2, R)
    b = pl.program_id(0)
    nb = pl.num_programs(0)
    r_per = xbuf.shape[1]

    def issue(block, slot):
        for r in range(r_per):                       # static unroll, R row DMAs
            row = perm_ref[block * r_per + r]
            pltpu.make_async_copy(
                x_hbm.at[pl.ds(row, 1)],             # (1, C) scattered HBM row
                xbuf.at[slot, pl.ds(r, 1)],          # (1, C) slot row
                sems.at[slot, r],
            ).start()

    @pl.when(b == 0)
    def _():
        issue(0, 0)                                  # prime slot 0

    slot = b % 2

    @pl.when(b + 1 < nb)
    def _():
        issue(b + 1, 1 - slot)                       # prefetch next block while we wait

    for r in range(r_per):                           # wait for the current block's rows
        pltpu.make_async_copy(
            x_hbm.at[pl.ds(0, 1)], xbuf.at[slot, pl.ds(r, 1)], sems.at[slot, r]
        ).wait()

    rows = xbuf[slot]                                # (R, C)
    scale = sc_ref[...].astype(jnp.float32)          # (R, 1)
    out_ref[...] = (rows.astype(jnp.float32) * scale).astype(out_ref.dtype)


def gather_scale_pallas(x, perm, score_perm, *, rows_per_step=8):
    """x[perm] * score[perm][:, None] as a batched, double-buffered K-row DMA gather."""
    n, c = x.shape
    k = perm.shape[0]
    k_pad = _round_up(k, rows_per_step)
    if k_pad != k:
        perm = jnp.pad(perm, (0, k_pad - k))                 # pad gathers row 0 ...
        score_perm = jnp.pad(score_perm, (0, k_pad - k))     # ... scaled by 0; sliced off
    sc_col = score_perm.astype(jnp.float32).reshape(k_pad, 1)
    num_blocks = k_pad // rows_per_step

    # TODO(synk): the cross-step double buffer forces sequential ("arbitrary") grid
    # semantics; a megacore split would need a leading per-core grid axis with
    # per-core pipeline priming.
    out = pl.pallas_call(
        _gather_scale_kernel,
        out_shape=jax.ShapeDtypeStruct((k_pad, c), x.dtype),
        grid_spec=pltpu.PrefetchScalarGridSpec(
            num_scalar_prefetch=1,
            grid=(num_blocks,),
            in_specs=[
                pl.BlockSpec((rows_per_step, 1), lambda b, perm_ref: (b, 0)),
                pl.BlockSpec(memory_space=pl.ANY),           # x stays in HBM
            ],
            out_specs=pl.BlockSpec((rows_per_step, c), lambda b, perm_ref: (b, 0)),
            scratch_shapes=[
                pltpu.VMEM((2, rows_per_step, c), x.dtype),
                pltpu.SemaphoreType.DMA((2, rows_per_step)),
            ],
        ),
        compiler_params=pltpu.CompilerParams(
            dimension_semantics=("arbitrary",)),
        cost_estimate=pl.CostEstimate(
            flops=k_pad * c,
            transcendentals=0,
            bytes_accessed=2 * k_pad * c * x.dtype.itemsize),
    )(perm, sc_col, x)
    return out[:k]


_GATHER_XLA_MIN_BYTES = 1 << 20   # below ~1 MB of output, XLA gather+mul beats a launch


def gather_scale(x, perm, score_perm):
    k = perm.shape[0]
    c = x.shape[1]
    if k * c * x.dtype.itemsize < _GATHER_XLA_MIN_BYTES:
        # Tiny K*C: a separate pallas_call costs more than the work itself.
        return (x[perm].astype(jnp.float32) * score_perm[:, None]).astype(x.dtype)
    return gather_scale_pallas(x, perm, score_perm)


# ------------------------------- Glue (JAX) ---------------------------------

def filter_adj(edge_index, perm, num_nodes):
    """JAX version of PyG filter_adj with static-shape (padded) output.

    Kept edges are renumbered into [0, k) and compacted to the front (original
    order preserved); invalid slots are padded with -1.
    """
    # TODO(synk): PyG returns a dynamically-sized edge_index; JAX needs static
    # shapes, so we return a padded (2, E) array plus the number of valid edges.
    mapping = jnp.full((num_nodes,), -1, dtype=jnp.int32)
    mapping = mapping.at[perm].set(jnp.arange(perm.shape[0], dtype=jnp.int32))
    row = mapping[edge_index[0]]
    col = mapping[edge_index[1]]
    valid = (row >= 0) & (col >= 0)
    order = jnp.argsort(jnp.where(valid, 0, 1), stable=True)
    row = jnp.where(valid, row, -1)[order]
    col = jnp.where(valid, col, -1)[order]
    return jnp.stack([row, col], axis=0), jnp.sum(valid.astype(jnp.int32))


def topk_pooling_forward(x, edge_index, weight, ratio=0.5, batch=None):
    """Forward of TopKPooling(in_channels=C, ratio, min_score=None, multiplier=1)."""
    n, _ = x.shape
    if batch is None:
        batch = jnp.zeros((n,), dtype=jnp.int32)   # single graph (default path)

    # Fold the weight norm out of the per-tile path: pre-normalize once.
    w_norm = jnp.sqrt(jnp.sum(weight.astype(jnp.float32) ** 2))
    w_n = (weight / jnp.maximum(w_norm, 1e-12)).astype(x.dtype)

    # score = tanh((x * w).sum(-1) / ||w||)   -- Pallas kernel (lane-dense output)
    score = score_pallas(x, w_n)                   # (N,) float32

    # TODO(synk): per-graph top-k for multi-graph batches; this implements the
    # single-graph (batch all-zero) path of PyG's topk().
    k = int(math.ceil(ratio * n))
    _, perm = jax.lax.top_k(score, k)              # descending, like torch.topk
    perm = perm.astype(jnp.int32)
    score_perm = score[perm]                       # (K,) f32, tiny gather in plain JAX

    # x[perm] * score[perm].view(-1, 1)  -- Pallas batched row gather (or XLA for tiny K*C)
    x_out = gather_scale(x, perm, score_perm)
    # multiplier == 1 -> no extra scaling

    batch_out = batch[perm]
    induced_edge_index, num_valid_edges = filter_adj(edge_index, perm, num_nodes=n)
    induced_edge_attr = None                       # edge_attr=None in this configuration
    return x_out, induced_edge_index, induced_edge_attr, batch_out, num_valid_edges


# --------------------------------- Main -------------------------------------

if __name__ == "__main__":
    # ---- small example matching the module's default usage -----------------
    N, C, E = 16, 32, 40
    RATIO = 0.5

    key = jax.random.PRNGKey(0)
    k_x, k_w, k_e, k_x2, k_w2 = jax.random.split(key, 5)

    # PyG uniform(size, weight) init: U(-1/sqrt(C), 1/sqrt(C)), shape (1, C).
    bound = 1.0 / math.sqrt(C)
    weight = jax.random.uniform(k_w, (1, C), jnp.float32, -bound, bound)

    x = jax.random.normal(k_x, (N, C), dtype=jnp.float32)
    edge_index = jax.random.randint(k_e, (2, E), 0, N, dtype=jnp.int32)

    x_out, e_out, e_attr, batch_out, n_valid = topk_pooling_forward(
        x, edge_index, weight, ratio=RATIO
    )
    jax.block_until_ready((x_out, e_out, batch_out, n_valid))

    K = int(math.ceil(RATIO * N))
    assert x_out.shape == (K, C)
    assert e_out.shape == (2, E)
    assert batch_out.shape == (K,)

    # numeric sanity vs. plain-JAX reference
    w_norm = jnp.maximum(jnp.sqrt(jnp.sum(weight ** 2)), 1e-12)
    ref_score = jnp.tanh(jnp.sum(x * weight, axis=-1) / w_norm)
    kern_score = score_pallas(x, weight / w_norm)
    assert jnp.allclose(kern_score, ref_score, rtol=1e-5, atol=1e-5)
    _, ref_perm = jax.lax.top_k(kern_score, K)
    ref_xout = x[ref_perm] * kern_score[ref_perm][:, None]
    assert jnp.allclose(x_out, ref_xout, rtol=1e-5, atol=1e-5)

    # ---- larger check: exercises the multi-tile / partial-last-block score path
    #      (no padding copy) and the batched manual-DMA gather kernel ---------
    N2, C2, K2 = 1000, 128, 500
    x2 = jax.random.normal(k_x2, (N2, C2), dtype=jnp.float32)
    w2 = jax.random.normal(k_w2, (1, C2), dtype=jnp.float32) * 0.1
    w2n = w2 / jnp.maximum(jnp.sqrt(jnp.sum(w2 ** 2)), 1e-12)

    # force tile_n = 256 -> grid of 4 with a partial (232-row) last block
    s2 = score_pallas(x2, w2n, target_tile_bytes=256 * C2 * 4)
    ref_s2 = jnp.tanh(x2 @ w2n[0])
    assert s2.shape == (N2,)
    assert jnp.allclose(s2, ref_s2, rtol=1e-5, atol=1e-5)

    _, perm2 = jax.lax.top_k(s2, K2)
    perm2 = perm2.astype(jnp.int32)
    sp2 = s2[perm2]
    g2 = gather_scale_pallas(x2, perm2, sp2)            # batched Pallas gather path
    ref_g2 = x2[perm2] * sp2[:, None]
    assert g2.shape == (K2, C2)
    assert jnp.allclose(g2, ref_g2, rtol=1e-5, atol=1e-5)

    jax.block_until_ready((s2, g2))
    print("KERNEL_OK")
</pallas_src>

<mosaic_0001>
module attributes {stable_mosaic.version = 11 : i64} {
  func.func @_score_kernel(%arg0: i32, %arg1: memref<16x32xf32, #tpu.memory_space<vmem>>, %arg2: memref<1x32xf32, #tpu.memory_space<vmem>>, %arg3: memref<1x16xf32, #tpu.memory_space<vmem>>) attributes {dimension_semantics = [#tpu.dimension_semantics<parallel>], iteration_bounds = array<i64: 1>, scalar_prefetch = 0 : i64, scratch_operands = 0 : i64, tpu.core_type = #tpu.core_type<tc>, window_params = [{transform_indices = @transform_0, window_bounds = array<i64: 16, 32>}, {pipeline_mode = #tpu.pipeline_mode<synchronous>, transform_indices = @transform_1, window_bounds = array<i64: 1, 32>}, {transform_indices = @transform_2, window_bounds = array<i64: 1, 16>}]} {
    %c0 = arith.constant 0 : index
    %c0_0 = arith.constant 0 : index
    %0 = vector.load %arg2[%c0, %c0_0] : memref<1x32xf32, #tpu.memory_space<vmem>>, vector<1x32xf32>
    %c0_1 = arith.constant 0 : index
    %c0_2 = arith.constant 0 : index
    %1 = vector.load %arg1[%c0_1, %c0_2] : memref<16x32xf32, #tpu.memory_space<vmem>>, vector<16x32xf32>
    %cst = arith.constant dense<0.000000e+00> : vector<1x16xf32>
    %2 = tpu.matmul %0, %1, %cst {dimension_numbers = #tpu.dot_dimension_numbers<[1], [1], [0], [0], [0, 0, 1, 0], [], []>} : vector<1x32xf32>, vector<16x32xf32>, vector<1x16xf32> -> vector<1x16xf32>
    %3 = math.tanh %2 : vector<1x16xf32>
    %c0_3 = arith.constant 0 : index
    %c0_4 = arith.constant 0 : index
    %4 = vector.load %arg3[%c0_3, %c0_4] : memref<1x16xf32, #tpu.memory_space<vmem>>, vector<1x16xf32>
    tpu.vector_store %arg3[%c0_3, %c0_4], %3 {strides = array<i32>} : memref<1x16xf32, #tpu.memory_space<vmem>>, vector<1x16xf32>,
    return
  }
  func.func @transform_0(%arg0: i32) -> (i32, i32) {
    %c0_i32 = arith.constant 0 : i32
    %c0_i32_0 = arith.constant 0 : i32
    return %arg0, %c0_i32 : i32, i32
  }
  func.func @transform_1(%arg0: i32) -> (i32, i32) {
    %c0_i32 = arith.constant 0 : i32
    %c0_i32_0 = arith.constant 0 : i32
    %c0_i32_1 = arith.constant 0 : i32
    return %c0_i32, %c0_i32_0 : i32, i32
  }
  func.func @transform_2(%arg0: i32) -> (i32, i32) {
    %c0_i32 = arith.constant 0 : i32
    %c0_i32_0 = arith.constant 0 : i32
    return %c0_i32, %arg0 : i32, i32
  }
}

</mosaic_0001>

<bundles_post_ra>
// kernel: tpu_custom_call.1
= control target key start
LH: loop header
LB: loop body
LE: loop exit
PB: predicated region body
PF: predicated region fallthrough
CT: control target
= control target key end

     0   :  { %7 = vsyncpa [#allocation3], 0  ;;  %s250_s0 = inlined_call_operand.hbm [shape: f32[16,32], index: 0, kind: input, shape index: {}]   ;;  %s251_s1 = inlined_call_operand.vmem [shape: f32[1,32], index: 1, kind: input, shape index: {}]   ;;  %s252_s2 = inlined_call_operand.hbm [shape: f32[1,16], index: 2, kind: output, shape index: {}]  }
   0x1   :  { %8 = vsyncpa [#allocation4], 0  ;;  %s201_s9 = smov [#allocation2]   ;;  %s153_s13 = scalar_lea.hbm %s250_s0, 256 }
   0x2   :  { %s14_s10 = sshll.u32 %s201_s9, 4  ;;  %p154_p0 = scmp.ne.s32.totalorder %s250_s0, %s153_s13  ;;  %s15_s10 = int_to_ptr.vmem [resolvable:$true] %s14_s10 }
   0x3   :  { %p157_p1 = scmp.lt.u32.totalorder %s153_s13, %s250_s0 }
   0x5   :  { %p159_p2 = pnand %p157_p1, %p154_p0 }
   0x7   :  { %162 = shalt.err (!%p159_p2)
}
   0x8   :  { %s163_s18 = scalar_lea.vmem %s15_s10, 256  ;;  %p168_p4 = scmp.lt.s32.totalorder %s15_s10, %s15_s10 }
   0x9   :  { %p164_p3 = scmp.ne.s32.totalorder %s15_s10, %s163_s18  ;;  %p169_p5 = scmp.lt.s32.totalorder %s163_s18, %s163_s18 }
   0xb   :  { %p170_p6 = por %p169_p5, %p168_p4 }
   0xd   :  { %p171_p7 = pnand %p170_p6, %p164_p3 }
   0xf   :  { %174 = shalt.err (!%p171_p7)
}
  0x10   :  { %s202_s19 = smov 128   ;;  %s203_s20 = smov 8  }
  0x11   :  { %20 = dma.hbm_to_vmem [thread:$0]  %s250_s0, 256, %s15_s10, [#allocation3], %s202_s19, %s202_s19, %s203_s20  }
  0x12   :  { %197 = dma.done.wait [#allocation3], 256  }
  0x13   :  { %198 = vsyncadd [#allocation3], 4294967040  ;;  %v204_v0 = vmov 0.0|0.0   ;;  %vm205_vm0 = vmmov 0   ;;  %v206_v1 = vmov 0.0   ;;  %vm29_vm1 = vcmask 261120  }
  0x14   :  { %140 = vmatprep.subr.bf16.mxu0 %v204_v0  ;;  %137 = vmatprep.mubr.msk.f32.mxu0 %vm205_vm0, %v206_v1  ;;  %v27_v2 = vld [vmem:[#allocation2] sm:$0xff]  ;;  %v28_v3 = vld [vmem:[#allocation2 + $0x8] sm:$0xff]  ;;  %vm142_vm2 = vmpackc.low %vm29_vm1, %vm29_vm1  ;;  %s207_s0 = smov [#allocation5]   ;;  %vm110_vm3 = vcmask 122880  }
  0x15   :  { %v141_v4 = vpack.c.bf16 %v28_v3, %v27_v2  ;;  %v26_v5 = vld [vmem:[%s251_s1] sm:$0x1]  ;;  %s118_s25 = sshll.u32 %s207_s0, 4  ;;  %s119_s25 = int_to_ptr.vmem [resolvable:$true] %s118_s25 }
  0x16   :  { %s175_s26 = scalar_lea.vmem %s119_s25, 16  ;;  %s179_s27 = scalar_lea.vmem %s119_s25, 32 }
  0x17   :  { %143 = vmatpush3.bf16.xpose.msk.msra.mxu0 %vm142_vm2, %v141_v4  ;;  %p176_p8 = scmp.ne.s32.totalorder %s119_s25, %s175_s26  ;;  %p180_p9 = scmp.lt.s32.totalorder %s119_s25, %s119_s25 }
  0x18   :  { %p181_p10 = scmp.lt.s32.totalorder %s179_s27, %s175_s26 }
  0x1a   :  { %p182_p11 = por %p181_p10, %p180_p9 }
  0x1c   :  { %p183_p12 = pnand %p182_p11, %p176_p8 }
  0x1e   :  { %138 = vmatmul.mubr.msk.f32.vlgmr.msra.gmra.mrb[0].mxu0 %vm29_vm1, %v26_v5 }
  0xf1   :  { %v105_v6 = vpop.f32.mrb[0].mxu0 }
  0xf2   :  { %151 = vtanh.f32 %v105_v6  ;;  %v139_v7 = vpop.f32.mrb[1].mxu0 }
  0xfc   :  { %v152_v8 = vpop.eup %151 }
  0xfd   :  { %111 = vst.msk [vmem:[#allocation5] sm:$0x1] %vm110_vm3, %v152_v8 }
  0xfe   :  { %186 = shalt.err (!%p183_p12)
}
  0xff   :  { %s187_s29 = scalar_lea.hbm %s252_s2, 16 }
 0x100   :  { %p188_p13 = scmp.ne.s32.totalorder %s252_s2, %s187_s29  ;;  %p191_p0 = scmp.lt.u32.totalorder %s187_s29, %s252_s2 }
 0x102   :  { %p193_p1 = pnand %p191_p0, %p188_p13 }
 0x104   :  { %196 = shalt.err (!%p193_p1)
}
 0x105   :  { %121 = dma.vmem_to_hbm [thread:$0]  %s119_s25, 16, %s252_s2, [#allocation4]  }
 0x106   :  { %199 = dma.done.wait [#allocation4], 16  }
 0x107   :  { %200 = vsyncadd [#allocation4], 4294967280 }
 0x108   :  { %125 = vsyncpa [#allocation3], 1 }
 0x109   :  { %126 = vsyncpa [#allocation4], 1 }

</bundles_post_ra>
